<compile_context>
chip_gen: v7x
topology: tpu7x:2x2x1
jax: 0.10.0
libtpu: 0.0.40
codegen_flags: <defaults>
</compile_context>

<pallas_src>
import math
import numpy as np
import jax
import jax.numpy as jnp
from jax.experimental import pallas as pl
from jax.experimental.pallas import tpu as pltpu

MAX_LENGTH = 200  # hard-coded in PositionalEncoding(d_model, max_length=200)


# ----------------------------------------------------------------------------
# helpers (plain JAX / numpy glue)
# ----------------------------------------------------------------------------
def adaptive_pool_matrix(in_size, out_size):
    """Row-stochastic matrix A so that y = A @ x reproduces torch adaptive_avg_pool1d."""
    A = np.zeros((out_size, in_size), dtype=np.float32)
    for i in range(out_size):
        s = (i * in_size) // out_size
        e = ((i + 1) * in_size + out_size - 1) // out_size  # ceil
        A[i, s:e] = 1.0 / (e - s)
    return A


def build_positional_encoding(d_model, max_length=MAX_LENGTH):
    enc = np.zeros((64, max_length, d_model), dtype=np.float32)
    pos = np.arange(max_length, dtype=np.float32)[:, None]
    div = np.exp(np.arange(0, d_model, 2, dtype=np.float32) * (-np.log(10000.0) / d_model))
    enc[0, :, 0::2] = np.sin(pos * div)
    enc[0, :, 1::2] = np.cos(pos * div)
    return jnp.asarray(enc)


# ----------------------------------------------------------------------------
# Kernels 1 & 2: tiny single-step matmul (+add) used for adaptive_avg_pool2d
# ----------------------------------------------------------------------------
def _mm_kernel(a_ref, b_ref, o_ref):
    o_ref[...] = jnp.dot(a_ref[...], b_ref[...], preferred_element_type=jnp.float32)


def _mm_add_kernel(a_ref, b_ref, c_ref, o_ref):
    o_ref[...] = (jnp.dot(a_ref[...], b_ref[...], preferred_element_type=jnp.float32)
                  + c_ref[...])


def _pl_matmul(a, b, add=None):
    M, K = a.shape
    N2 = b.shape[1]
    out_shape = jax.ShapeDtypeStruct((M, N2), jnp.float32)
    in_specs = [pl.BlockSpec((M, K), lambda i: (0, 0)),
                pl.BlockSpec((K, N2), lambda i: (0, 0))]
    args = (a, b)
    kern = _mm_kernel
    if add is not None:
        in_specs = in_specs + [pl.BlockSpec((M, N2), lambda i: (0, 0))]
        args = (a, b, add)
        kern = _mm_add_kernel
    return pl.pallas_call(
        kern,
        out_shape=out_shape,
        grid=(1,),
        in_specs=in_specs,
        out_specs=pl.BlockSpec((M, N2), lambda i: (0, 0)),
    )(*args)


def pallas_adaptive_pool_batch_major(x_chw, out_rows, out_cols, add_2d=None):
    """adaptive_avg_pool2d(x, (out_rows, out_cols)) (+ optional add, given as a
    (out_rows, C*out_cols) slab) returned batch-major as (out_rows, C, out_cols) so it
    feeds the decoder directly."""
    C, Hh, W = x_chw.shape
    awt = jnp.asarray(adaptive_pool_matrix(W, out_cols)).T          # (W, OW)
    ah = jnp.asarray(adaptive_pool_matrix(Hh, out_rows))            # (P, H)
    # Stage 1: pool the last spatial axis with one (C*H, W) @ (W, OW) matmul.
    u = _pl_matmul(x_chw.reshape(C * Hh, W), awt)                   # (C*H, OW)
    # Layout plumbing (tiny, wrapper-side): expose H as the contraction axis with a
    # lane-dense (H, C*OW) right operand.
    ut = jnp.transpose(u.reshape(C, Hh, out_cols), (1, 0, 2)).reshape(Hh, C * out_cols)
    # Stage 2: pool the first spatial axis (+ positional encoding); lane-dense output.
    y = _pl_matmul(ah, ut, add_2d)                                  # (P, C*OW)
    return y.reshape(out_rows, C, out_cols)


# ----------------------------------------------------------------------------
# Kernel 3: the full decoder stack (all layers fused, residual resident in VMEM)
# ----------------------------------------------------------------------------
_PACK_ORDER = ('wqkv', 'bqkv', 'wo', 'bo', 'ln', 'w1', 'b1', 'w2', 'b2')


def make_decoder_kernel(n_tile, L, S, D, num_heads):
    H = num_heads
    dh = D // H
    eps = 1e-5
    ML = n_tile * L
    MS = n_tile * S

    def layernorm(v, g, b):
        mu = jnp.mean(v, axis=-1, keepdims=True)
        c = v - mu
        var = jnp.mean(c * c, axis=-1, keepdims=True)
        return c * jax.lax.rsqrt(var + eps) * g + b

    def kernel(x_ref, enc_ref, wqkv_ref, bqkv_ref, wo_ref, bo_ref,
               ln_ref, w1_ref, b1_ref, w2_ref, b2_ref, o_ref):
        layer = pl.program_id(1)

        # Seed the resident residual stream at layer 0 (o_ref block index is constant
        # across the layer axis, so it stays in VMEM for all layers of this batch tile).
        @pl.when(layer == 0)
        def _():
            o_ref[...] = x_ref[...]

        x2d = o_ref[...].reshape(ML, D)                             # f32 residual stream
        enc_bf = enc_ref[...].reshape(MS, D).astype(jnp.bfloat16)

        def mha(q_bf, kv_bf, Lk, t):
            """q_bf: (ML, D) bf16 queries; kv_bf: (n_tile*Lk, D) bf16 keys/values;
            t = 0 (self) / 1 (cross).  Q weights/bias are pre-scaled by 1/sqrt(dh)."""
            out = jnp.zeros((ML, D), jnp.float32)
            base = t * 3 * H
            for h in range(H):
                wq = wqkv_ref[0, base + h]
                wk = wqkv_ref[0, base + H + h]
                wv = wqkv_ref[0, base + 2 * H + h]
                bq = bqkv_ref[0, base + h]
                bk = bqkv_ref[0, base + H + h]
                bv = bqkv_ref[0, base + 2 * H + h]
                q = jnp.dot(q_bf, wq, preferred_element_type=jnp.float32) + bq    # (ML, dh)
                k = jnp.dot(kv_bf, wk, preferred_element_type=jnp.float32) + bk
                v = jnp.dot(kv_bf, wv, preferred_element_type=jnp.float32) + bv
                q3 = q.reshape(n_tile, L, dh)
                k3 = k.reshape(n_tile, Lk, dh)
                v3 = v.reshape(n_tile, Lk, dh).astype(jnp.bfloat16)
                s = jnp.einsum('bld,bmd->blm', q3, k3,
                               preferred_element_type=jnp.float32)                 # (b,L,Lk)
                s = s - jnp.max(s, axis=-1, keepdims=True)
                p = jnp.exp(s)
                p = p * pl.reciprocal(jnp.sum(p, axis=-1, keepdims=True), approx=True)
                ctx = jnp.einsum('blm,bmd->bld', p.astype(jnp.bfloat16), v3,
                                 preferred_element_type=jnp.float32)               # (b,L,dh)
                out = out + jnp.dot(ctx.reshape(ML, dh).astype(jnp.bfloat16),
                                    wo_ref[0, t * H + h],
                                    preferred_element_type=jnp.float32)
            return out + bo_ref[0, t]

        # --- self attention (residual) ---
        xn = layernorm(x2d, ln_ref[0, 0], ln_ref[0, 1])
        xn_bf = xn.astype(jnp.bfloat16)
        x2d = x2d + mha(xn_bf, xn_bf, L, 0)

        # --- cross attention on the pooled encoder output ---
        xn = layernorm(x2d, ln_ref[0, 2], ln_ref[0, 3])
        x2d = x2d + mha(xn.astype(jnp.bfloat16), enc_bf, S, 1)

        # --- feed-forward ---
        xn = layernorm(x2d, ln_ref[0, 4], ln_ref[0, 5])
        h1 = jnp.maximum(
            jnp.dot(xn.astype(jnp.bfloat16), w1_ref[0],
                    preferred_element_type=jnp.float32) + b1_ref[0], 0.0)
        x2d = x2d + jnp.dot(h1.astype(jnp.bfloat16), w2_ref[0],
                            preferred_element_type=jnp.float32) + b2_ref[0]

        o_ref[...] = x2d.reshape(n_tile, L, D)

    return kernel


def decoder_stack(x_nld, enc_nsd, packed, *, num_heads, n_tile=50):
    N, L, D = x_nld.shape
    _, S, _ = enc_nsd.shape
    num_layers = packed['w1'].shape[0]
    assert N % n_tile == 0, (N, n_tile)
    kernel = make_decoder_kernel(n_tile, L, S, D, num_heads)

    def layer_spec(arr):
        return pl.BlockSpec((1,) + arr.shape[1:],
                            lambda i, l, _z=(0,) * (arr.ndim - 1): (l,) + _z)

    w_args = [packed[k] for k in _PACK_ORDER]
    in_specs = ([pl.BlockSpec((n_tile, L, D), lambda i, l: (i, 0, 0)),
                 pl.BlockSpec((n_tile, S, D), lambda i, l: (i, 0, 0))]
                + [layer_spec(a) for a in w_args])

    return pl.pallas_call(
        kernel,
        out_shape=jax.ShapeDtypeStruct((N, L, D), jnp.float32),
        grid=(N // n_tile, num_layers),
        in_specs=in_specs,
        out_specs=pl.BlockSpec((n_tile, L, D), lambda i, l: (i, 0, 0)),
        compiler_params=pltpu.CompilerParams(
            dimension_semantics=("parallel", "arbitrary"),
            vmem_limit_bytes=48 * 1024 * 1024),
    )(x_nld, enc_nsd, *w_args)


# ----------------------------------------------------------------------------
# Weight packing: split per head, fold the attention scale into Q, stack layers,
# cast matmul weights to bf16 (biases / LayerNorm params stay f32).
# ----------------------------------------------------------------------------
def pack_params(layer_params, D, num_heads):
    H = num_heads
    dh = D // H
    scale = 1.0 / math.sqrt(dh)

    def heads_w(w):                       # (D, D) -> (H, D, dh)
        return jnp.transpose(w.reshape(D, H, dh), (1, 0, 2))

    def heads_b(b):                       # (1, D) -> (H, 1, dh)
        return b.reshape(H, dh)[:, None, :]

    acc = {k: [] for k in _PACK_ORDER}
    for p in layer_params:
        wqkv_t, bqkv_t, wo_t, bo_t = [], [], [], []
        for tag in ('s', 'c'):
            wqkv, bqkv = p['wqkv_' + tag], p['bqkv_' + tag]
            wq, wk, wv = wqkv[:, :D], wqkv[:, D:2 * D], wqkv[:, 2 * D:]
            bq, bk, bv = bqkv[:, :D], bqkv[:, D:2 * D], bqkv[:, 2 * D:]
            wqkv_t.append(jnp.stack([heads_w(wq) * scale, heads_w(wk), heads_w(wv)]))
            bqkv_t.append(jnp.stack([heads_b(bq) * scale, heads_b(bk), heads_b(bv)]))
            wo_t.append(p['wo_' + tag].reshape(H, dh, D))
            bo_t.append(p['bo_' + tag])
        acc['wqkv'].append(jnp.stack(wqkv_t).reshape(6 * H, D, dh))
        acc['bqkv'].append(jnp.stack(bqkv_t).reshape(6 * H, 1, dh))
        acc['wo'].append(jnp.stack(wo_t).reshape(2 * H, dh, D))
        acc['bo'].append(jnp.stack(bo_t))                                  # (2, 1, D)
        acc['ln'].append(jnp.stack([p['ln1g'], p['ln1b'], p['ln2g'], p['ln2b'],
                                    p['ln3g'], p['ln3b']]))                # (6, 1, D)
        acc['w1'].append(p['w1']); acc['b1'].append(p['b1'])
        acc['w2'].append(p['w2']); acc['b2'].append(p['b2'])

    bf16_keys = ('wqkv', 'wo', 'w1', 'w2')
    out = {}
    for k in _PACK_ORDER:
        arr = jnp.stack(acc[k])
        out[k] = arr.astype(jnp.bfloat16) if k in bf16_keys else arr.astype(jnp.float32)
    return out


# ----------------------------------------------------------------------------
# Full model wrapper
# ----------------------------------------------------------------------------
def transformer_decoder(x_chw, enc_chw, packed, pos_enc, *, num_heads, n_tile=50):
    C = x_chw.shape[0]
    D = pos_enc.shape[-1]
    # PositionalEncoding: adaptive_avg_pool2d(x, (200, D)) + sin/cos buffer, produced
    # directly in the (batch=200, seq=C, D) layout the decoder consumes.
    pos_2d = jnp.transpose(pos_enc, (1, 0, 2)).reshape(MAX_LENGTH, C * D)
    x_nld = pallas_adaptive_pool_batch_major(x_chw, MAX_LENGTH, D, add_2d=pos_2d)
    # The per-layer encoder pooling target is identical every layer -> pool once.
    enc_nsd = pallas_adaptive_pool_batch_major(enc_chw, MAX_LENGTH, D)
    y_nld = decoder_stack(x_nld, enc_nsd, packed, num_heads=num_heads, n_tile=n_tile)
    return jnp.transpose(y_nld, (1, 0, 2))   # back to PyTorch (seq, batch, embed)


def init_layer_params(key, D, hidden):
    ks = jax.random.split(key, 12)

    def w(k, shape, scale):
        return jax.random.normal(k, shape, jnp.float32) * scale

    sD, sH = 1.0 / math.sqrt(D), 1.0 / math.sqrt(hidden)
    return {
        'wqkv_s': w(ks[0], (D, 3 * D), sD), 'bqkv_s': w(ks[1], (1, 3 * D), 0.01),
        'wo_s': w(ks[2], (D, D), sD),       'bo_s': w(ks[3], (1, D), 0.01),
        'wqkv_c': w(ks[4], (D, 3 * D), sD), 'bqkv_c': w(ks[5], (1, 3 * D), 0.01),
        'wo_c': w(ks[6], (D, D), sD),       'bo_c': w(ks[7], (1, D), 0.01),
        'ln1g': jnp.ones((1, D)), 'ln1b': jnp.zeros((1, D)),
        'ln2g': jnp.ones((1, D)), 'ln2b': jnp.zeros((1, D)),
        'ln3g': jnp.ones((1, D)), 'ln3b': jnp.zeros((1, D)),
        'w1': w(ks[8], (D, hidden), sD), 'b1': w(ks[9], (1, hidden), 0.01),
        'w2': w(ks[10], (hidden, D), sH), 'b2': w(ks[11], (1, D), 0.01),
    }


# ----------------------------------------------------------------------------
# Pure-JAX reference (f32, same math) used for a correctness check
# ----------------------------------------------------------------------------
def _ref_layernorm(v, g, b):
    mu = jnp.mean(v, -1, keepdims=True)
    var = jnp.mean((v - mu) ** 2, -1, keepdims=True)
    return (v - mu) / jnp.sqrt(var + 1e-5) * g + b


def _ref_mha(q_in, kv_in, wqkv, bqkv, wo, bo, num_heads):
    N, L, D = q_in.shape
    dh = D // num_heads
    q = q_in @ wqkv[:, :D] + bqkv[0, :D]
    k = kv_in @ wqkv[:, D:2 * D] + bqkv[0, D:2 * D]
    v = kv_in @ wqkv[:, 2 * D:] + bqkv[0, 2 * D:]
    qh = q.reshape(N, L, num_heads, dh)
    kh = k.reshape(N, -1, num_heads, dh)
    vh = v.reshape(N, -1, num_heads, dh)
    s = jnp.einsum('nlhd,nmhd->nhlm', qh, kh) / math.sqrt(dh)
    p = jax.nn.softmax(s, axis=-1)
    o = jnp.einsum('nhlm,nmhd->nlhd', p, vh).reshape(N, L, D)
    return o @ wo + bo[0]


def _ref_layer(x, enc, p, num_heads):
    xn = _ref_layernorm(x, p['ln1g'], p['ln1b'])
    x = x + _ref_mha(xn, xn, p['wqkv_s'], p['bqkv_s'], p['wo_s'], p['bo_s'], num_heads)
    xn = _ref_layernorm(x, p['ln2g'], p['ln2b'])
    x = x + _ref_mha(xn, enc, p['wqkv_c'], p['bqkv_c'], p['wo_c'], p['bo_c'], num_heads)
    xn = _ref_layernorm(x, p['ln3g'], p['ln3b'])
    h = jax.nn.relu(xn @ p['w1'] + p['b1'][0])
    return x + h @ p['w2'] + p['b2'][0]


def ref_forward(x_chw, enc_chw, layer_params, pos_enc, num_heads, D):
    ah = jnp.asarray(adaptive_pool_matrix(x_chw.shape[1], MAX_LENGTH))
    aw = jnp.asarray(adaptive_pool_matrix(x_chw.shape[2], D))
    xp = jnp.einsum('ph,chw,qw->cpq', ah, x_chw, aw) + pos_enc
    ahe = jnp.asarray(adaptive_pool_matrix(enc_chw.shape[1], MAX_LENGTH))
    awe = jnp.asarray(adaptive_pool_matrix(enc_chw.shape[2], D))
    ep = jnp.einsum('ph,chw,qw->cpq', ahe, enc_chw, awe)
    x = jnp.transpose(xp, (1, 0, 2))
    e = jnp.transpose(ep, (1, 0, 2))
    for p in layer_params:
        x = _ref_layer(x, e, p, num_heads)
    return jnp.transpose(x, (1, 0, 2))


# ----------------------------------------------------------------------------
if __name__ == "__main__":
    D = 32          # output_dim / d_model
    num_heads = 4
    num_layers = 2
    hidden = 64     # hidden_dim of the FFN

    key = jax.random.PRNGKey(0)
    kx, ke, kp = jax.random.split(key, 3)
    x = jax.random.normal(kx, (64, 16, 16), jnp.float32)        # channels must be 64 to
    enc_out = jax.random.normal(ke, (8, 16, 16), jnp.float32)   # match the encoding buffer

    pos_enc = build_positional_encoding(D, MAX_LENGTH)          # (64, 200, D)
    layer_params = [init_layer_params(k, D, hidden)
                    for k in jax.random.split(kp, num_layers)]
    packed = pack_params(layer_params, D, num_heads)

    out = transformer_decoder(x, enc_out, packed, pos_enc, num_heads=num_heads, n_tile=50)
    out = jax.block_until_ready(out)
    assert out.shape == (64, MAX_LENGTH, D)
    assert bool(jnp.all(jnp.isfinite(out)))

    with jax.default_matmul_precision("highest"):
        ref = jax.block_until_ready(
            ref_forward(x, enc_out, layer_params, pos_enc, num_heads, D))
    err = float(jnp.max(jnp.abs(out - ref)))
    # Tolerance accounts for the deliberate bf16 matmul-operand quantization
    # (f32 accumulation); structural bugs would be orders of magnitude larger.
    tol = 1e-1 * max(float(jnp.max(jnp.abs(ref))), 1.0)
    assert err < tol, f"max abs err {err} vs tol {tol}"

    print("KERNEL_OK")
</pallas_src>

<mosaic_0001>
module attributes {stable_mosaic.version = 11 : i64} {
  func.func @_mm_kernel(%arg0: i32, %arg1: memref<1024x16xf32, #tpu.memory_space<vmem>>, %arg2: memref<16x32xf32, #tpu.memory_space<vmem>>, %arg3: memref<1024x32xf32, #tpu.memory_space<vmem>>) attributes {dimension_semantics = [#tpu.dimension_semantics<arbitrary>], iteration_bounds = array<i64: 1>, scalar_prefetch = 0 : i64, scratch_operands = 0 : i64, tpu.core_type = #tpu.core_type<tc>, window_params = [{pipeline_mode = #tpu.pipeline_mode<synchronous>, transform_indices = @transform_0, window_bounds = array<i64: 1024, 16>}, {pipeline_mode = #tpu.pipeline_mode<synchronous>, transform_indices = @transform_1, window_bounds = array<i64: 16, 32>}, {pipeline_mode = #tpu.pipeline_mode<synchronous>, transform_indices = @transform_2, window_bounds = array<i64: 1024, 32>}]} {
    %c0 = arith.constant 0 : index
    %c0_0 = arith.constant 0 : index
    %0 = vector.load %arg1[%c0, %c0_0] : memref<1024x16xf32, #tpu.memory_space<vmem>>, vector<1024x16xf32>
    %c0_1 = arith.constant 0 : index
    %c0_2 = arith.constant 0 : index
    %1 = vector.load %arg2[%c0_1, %c0_2] : memref<16x32xf32, #tpu.memory_space<vmem>>, vector<16x32xf32>
    %cst = arith.constant dense<0.000000e+00> : vector<1024x32xf32>
    %2 = tpu.matmul %0, %1, %cst {dimension_numbers = #tpu.dot_dimension_numbers<[1], [0], [0], [1], [0, 0, 1, 1], [], []>} : vector<1024x16xf32>, vector<16x32xf32>, vector<1024x32xf32> -> vector<1024x32xf32>
    %c0_3 = arith.constant 0 : index
    %c0_4 = arith.constant 0 : index
    %3 = vector.load %arg3[%c0_3, %c0_4] : memref<1024x32xf32, #tpu.memory_space<vmem>>, vector<1024x32xf32>
    tpu.vector_store %arg3[%c0_3, %c0_4], %2 {strides = array<i32>} : memref<1024x32xf32, #tpu.memory_space<vmem>>, vector<1024x32xf32>,
    return
  }
  func.func @transform_0(%arg0: i32) -> (i32, i32) {
    %c0_i32 = arith.constant 0 : i32
    %c0_i32_0 = arith.constant 0 : i32
    %c0_i32_1 = arith.constant 0 : i32
    return %c0_i32, %c0_i32_0 : i32, i32
  }
  func.func @transform_1(%arg0: i32) -> (i32, i32) {
    %c0_i32 = arith.constant 0 : i32
    %c0_i32_0 = arith.constant 0 : i32
    %c0_i32_1 = arith.constant 0 : i32
    return %c0_i32, %c0_i32_0 : i32, i32
  }
  func.func @transform_2(%arg0: i32) -> (i32, i32) {
    %c0_i32 = arith.constant 0 : i32
    %c0_i32_0 = arith.constant 0 : i32
    %c0_i32_1 = arith.constant 0 : i32
    return %c0_i32, %c0_i32_0 : i32, i32
  }
}

</mosaic_0001>

<bundles_post_ra>
// kernel: tpu_custom_call.1
= control target key start
LH: loop header
LB: loop body
LE: loop exit
PB: predicated region body
PF: predicated region fallthrough
CT: control target
= control target key end

     0   :  { %vm141_vm0 = vcmask 130048   ;;  %vm1231_vm1 = vcmask 261120   ;;  %s2869_s1 = inlined_call_operand.vmem [shape: f32[16,32], index: 1, kind: input, shape index: {}]   ;;  %s2870_s0 = inlined_call_operand.vmem [shape: f32[1024,16], index: 0, kind: input, shape index: {}]   ;;  %s2871_s2 = inlined_call_operand.vmem [shape: f32[1024,32], index: 2, kind: output, shape index: {}]  }
   0x1   :  { %v139_v0 = vld [vmem:[%s2869_s1] sm:$0xff]  ;;  %v140_v1 = vld [vmem:[%s2869_s1 + $0x8] sm:$0xff]  ;;  %v13_v7 = vld [vmem:[%s2870_s0 + $0x10] sm:$0xff] }
   0x2   :  { %v11_v2 = vld [vmem:[%s2870_s0] sm:$0xff]  ;;  %v1818_v3 = vpack.c.bf16 %v140_v1, %v139_v0  ;;  %v12_v5 = vld [vmem:[%s2870_s0 + $0x8] sm:$0xff]  ;;  %v77_v8 = vld [vmem:[%s2870_s0 + $0x210] sm:$0xff] }
   0x3   :  { %1626 = vmatprep.mubr.msk.f32.mxu0 %vm141_vm0, %v11_v2  ;;  %v75_v4 = vld [vmem:[%s2870_s0 + $0x200] sm:$0xff]  ;;  %v76_v6 = vld [vmem:[%s2870_s0 + $0x208] sm:$0xff]  ;;  %v14_v9 = vld [vmem:[%s2870_s0 + $0x18] sm:$0xff] }
   0x4   :  { %1722 = vmatprep.mubr.msk.f32.mxu1 %vm141_vm0, %v75_v4  ;;  %1819 = vmatprep.subr.bf16.mxu0 %v1818_v3  ;;  %v78_v10 = vld [vmem:[%s2870_s0 + $0x218] sm:$0xff]  ;;  %v15_v11 = vld [vmem:[%s2870_s0 + $0x20] sm:$0xff]  ;;  %v16_v13 = vld [vmem:[%s2870_s0 + $0x28] sm:$0xff] }
   0x5   :  { %1822 = vmatprep.subr.bf16.mxu1 %v1818_v3  ;;  %1821 = vmatpush3.bf16.msra.mxu0 %v1818_v3  ;;  %v79_v12 = vld [vmem:[%s2870_s0 + $0x220] sm:$0xff]  ;;  %v80_v14 = vld [vmem:[%s2870_s0 + $0x228] sm:$0xff]  ;;  %v17_v15 = vld [vmem:[%s2870_s0 + $0x30] sm:$0xff] }
   0x6   :  { %1823 = vmatpush3.bf16.msra.mxu1 %v1818_v3  ;;  %v81_v16 = vld [vmem:[%s2870_s0 + $0x230] sm:$0xff]  ;;  %v18_v17 = vld [vmem:[%s2870_s0 + $0x38] sm:$0xff]  ;;  %v19_v19 = vld [vmem:[%s2870_s0 + $0x40] sm:$0xff] }
   0x7   :  { %v82_v18 = vld [vmem:[%s2870_s0 + $0x238] sm:$0xff]  ;;  %v83_v20 = vld [vmem:[%s2870_s0 + $0x240] sm:$0xff]  ;;  %v20_v21 = vld [vmem:[%s2870_s0 + $0x48] sm:$0xff] }
   0x8   :  { %1627 = vmatmul.mubr.msk.f32.vlgmr.msra.gmra.mrb[0].mxu0 %vm141_vm0, %v12_v5  ;;  %v84_v22 = vld [vmem:[%s2870_s0 + $0x248] sm:$0xff]  ;;  %v21_v23 = vld [vmem:[%s2870_s0 + $0x50] sm:$0xff]  ;;  %v22_v25 = vld [vmem:[%s2870_s0 + $0x58] sm:$0xff] }
   0x9   :  { %1723 = vmatmul.mubr.msk.f32.vlgmr.msra.gmra.mrb[0].mxu1 %vm141_vm0, %v76_v6  ;;  %1629 = vmatprep.mubr.msk.f32.mxu0 %vm141_vm0, %v13_v7  ;;  %v85_v24 = vld [vmem:[%s2870_s0 + $0x250] sm:$0xff]  ;;  %v86_v26 = vld [vmem:[%s2870_s0 + $0x258] sm:$0xff]  ;;  %v23_v27 = vld [vmem:[%s2870_s0 + $0x60] sm:$0xff] }
   0xa   :  { %1725 = vmatprep.mubr.msk.f32.mxu1 %vm141_vm0, %v77_v8  ;;  %v87_v28 = vld [vmem:[%s2870_s0 + $0x260] sm:$0xff]  ;;  %v24_v29 = vld [vmem:[%s2870_s0 + $0x68] sm:$0xff]  ;;  %v25_v31 = vld [vmem:[%s2870_s0 + $0x70] sm:$0xff] }
   0xb   :  { %v88_v30 = vld [vmem:[%s2870_s0 + $0x268] sm:$0xff]  ;;  %v89_v32 = vld [vmem:[%s2870_s0 + $0x270] sm:$0xff]  ;;  %v26_v33 = vld [vmem:[%s2870_s0 + $0x78] sm:$0xff] }
   0xc   :  { %1630 = vmatmul.mubr.msk.f32.gmra.mrb[2].mxu0 %vm141_vm0, %v14_v9  ;;  %v90_v34 = vld [vmem:[%s2870_s0 + $0x278] sm:$0xff]  ;;  %v27_v35 = vld [vmem:[%s2870_s0 + $0x80] sm:$0xff]  ;;  %v28_v37 = vld [vmem:[%s2870_s0 + $0x88] sm:$0xff] }
   0xd   :  { %1726 = vmatmul.mubr.msk.f32.gmra.mrb[2].mxu1 %vm141_vm0, %v78_v10  ;;  %1632 = vmatprep.mubr.msk.f32.mxu0 %vm141_vm0, %v15_v11  ;;  %v91_v36 = vld [vmem:[%s2870_s0 + $0x280] sm:$0xff]  ;;  %v92_v38 = vld [vmem:[%s2870_s0 + $0x288] sm:$0xff]  ;;  %v29_v39 = vld [vmem:[%s2870_s0 + $0x90] sm:$0xff] }
   0xe   :  { %1728 = vmatprep.mubr.msk.f32.mxu1 %vm141_vm0, %v79_v12  ;;  %v93_v40 = vld [vmem:[%s2870_s0 + $0x290] sm:$0xff]  ;;  %v30_v41 = vld [vmem:[%s2870_s0 + $0x98] sm:$0xff]  ;;  %v31_v43 = vld [vmem:[%s2870_s0 + $0xa0] sm:$0xff] }
   0xf   :  { %v94_v42 = vld [vmem:[%s2870_s0 + $0x298] sm:$0xff]  ;;  %v95_v44 = vld [vmem:[%s2870_s0 + $0x2a0] sm:$0xff]  ;;  %v32_v45 = vld [vmem:[%s2870_s0 + $0xa8] sm:$0xff] }
  0x10   :  { %1633 = vmatmul.mubr.msk.f32.gmra.mrb[4].mxu0 %vm141_vm0, %v16_v13  ;;  %v96_v46 = vld [vmem:[%s2870_s0 + $0x2a8] sm:$0xff]  ;;  %v33_v47 = vld [vmem:[%s2870_s0 + $0xb0] sm:$0xff]  ;;  %v34_v49 = vld [vmem:[%s2870_s0 + $0xb8] sm:$0xff] }
  0x11   :  { %1729 = vmatmul.mubr.msk.f32.gmra.mrb[4].mxu1 %vm141_vm0, %v80_v14  ;;  %1635 = vmatprep.mubr.msk.f32.mxu0 %vm141_vm0, %v17_v15  ;;  %v97_v48 = vld [vmem:[%s2870_s0 + $0x2b0] sm:$0xff]  ;;  %v98_v50 = vld [vmem:[%s2870_s0 + $0x2b8] sm:$0xff]  ;;  %v35_v51 = vld [vmem:[%s2870_s0 + $0xc0] sm:$0xff] }
  0x12   :  { %1731 = vmatprep.mubr.msk.f32.mxu1 %vm141_vm0, %v81_v16  ;;  %v99_v52 = vld [vmem:[%s2870_s0 + $0x2c0] sm:$0xff]  ;;  %v36_v53 = vld [vmem:[%s2870_s0 + $0xc8] sm:$0xff]  ;;  %v37_v55 = vld [vmem:[%s2870_s0 + $0xd0] sm:$0xff] }
  0x13   :  { %v100_v54 = vld [vmem:[%s2870_s0 + $0x2c8] sm:$0xff]  ;;  %v101_v56 = vld [vmem:[%s2870_s0 + $0x2d0] sm:$0xff]  ;;  %v38_v57 = vld [vmem:[%s2870_s0 + $0xd8] sm:$0xff] }
  0x14   :  { %1636 = vmatmul.mubr.msk.f32.gmra.mrb[6].mxu0 %vm141_vm0, %v18_v17  ;;  %v102_v58 = vld [vmem:[%s2870_s0 + $0x2d8] sm:$0xff]  ;;  %v39_v59 = vld [vmem:[%s2870_s0 + $0xe0] sm:$0xff]  ;;  %v40_v61 = vld [vmem:[%s2870_s0 + $0xe8] sm:$0xff] }
  0x15   :  { %1732 = vmatmul.mubr.msk.f32.gmra.mrb[6].mxu1 %vm141_vm0, %v82_v18  ;;  %1638 = vmatprep.mubr.msk.f32.mxu0 %vm141_vm0, %v19_v19  ;;  %v103_v60 = vld [vmem:[%s2870_s0 + $0x2e0] sm:$0xff]  ;;  %v104_v62 = vld [vmem:[%s2870_s0 + $0x2e8] sm:$0xff]  ;;  %v41_v63 = vld [vmem:[%s2870_s0 + $0xf0] sm:$0xff] }
  0x16   :  { %1734 = vmatprep.mubr.msk.f32.mxu1 %vm141_vm0, %v83_v20  ;;  %v105_v0 = vld [vmem:[%s2870_s0 + $0x2f0] sm:$0xff]  ;;  %v42_v1 = vld [vmem:[%s2870_s0 + $0xf8] sm:$0xff]  ;;  %v43_v3 = vld [vmem:[%s2870_s0 + $0x100] sm:$0xff] }
  0x17   :  { %v106_v2 = vld [vmem:[%s2870_s0 + $0x2f8] sm:$0xff]  ;;  %v107_v4 = vld [vmem:[%s2870_s0 + $0x300] sm:$0xff]  ;;  %v44_v5 = vld [vmem:[%s2870_s0 + $0x108] sm:$0xff] }
  0x18   :  { %1639 = vmatmul.mubr.msk.f32.gmra.mrb[8].mxu0 %vm141_vm0, %v20_v21  ;;  %v108_v6 = vld [vmem:[%s2870_s0 + $0x308] sm:$0xff]  ;;  %v45_v7 = vld [vmem:[%s2870_s0 + $0x110] sm:$0xff]  ;;  %v46_v9 = vld [vmem:[%s2870_s0 + $0x118] sm:$0xff] }
  0x19   :  { %1735 = vmatmul.mubr.msk.f32.gmra.mrb[8].mxu1 %vm141_vm0, %v84_v22  ;;  %1641 = vmatprep.mubr.msk.f32.mxu0 %vm141_vm0, %v21_v23  ;;  %v109_v8 = vld [vmem:[%s2870_s0 + $0x310] sm:$0xff]  ;;  %v110_v10 = vld [vmem:[%s2870_s0 + $0x318] sm:$0xff]  ;;  %v47_v11 = vld [vmem:[%s2870_s0 + $0x120] sm:$0xff] }
  0x1a   :  { %1737 = vmatprep.mubr.msk.f32.mxu1 %vm141_vm0, %v85_v24  ;;  %v111_v12 = vld [vmem:[%s2870_s0 + $0x320] sm:$0xff]  ;;  %v48_v13 = vld [vmem:[%s2870_s0 + $0x128] sm:$0xff]  ;;  %v49_v15 = vld [vmem:[%s2870_s0 + $0x130] sm:$0xff] }
  0x1b   :  { %v112_v14 = vld [vmem:[%s2870_s0 + $0x328] sm:$0xff]  ;;  %v113_v16 = vld [vmem:[%s2870_s0 + $0x330] sm:$0xff]  ;;  %v50_v17 = vld [vmem:[%s2870_s0 + $0x138] sm:$0xff] }
  0x1c   :  { %1642 = vmatmul.mubr.msk.f32.gmra.mrb[10].mxu0 %vm141_vm0, %v22_v25  ;;  %v114_v18 = vld [vmem:[%s2870_s0 + $0x338] sm:$0xff]  ;;  %v51_v19 = vld [vmem:[%s2870_s0 + $0x140] sm:$0xff]  ;;  %v52_v21 = vld [vmem:[%s2870_s0 + $0x148] sm:$0xff] }
  0x1d   :  { %1738 = vmatmul.mubr.msk.f32.gmra.mrb[10].mxu1 %vm141_vm0, %v86_v26  ;;  %1644 = vmatprep.mubr.msk.f32.mxu0 %vm141_vm0, %v23_v27  ;;  %v115_v20 = vld [vmem:[%s2870_s0 + $0x340] sm:$0xff]  ;;  %v116_v22 = vld [vmem:[%s2870_s0 + $0x348] sm:$0xff]  ;;  %v53_v23 = vld [vmem:[%s2870_s0 + $0x150] sm:$0xff] }
  0x1e   :  { %1740 = vmatprep.mubr.msk.f32.mxu1 %vm141_vm0, %v87_v28  ;;  %v117_v24 = vld [vmem:[%s2870_s0 + $0x350] sm:$0xff]  ;;  %v54_v25 = vld [vmem:[%s2870_s0 + $0x158] sm:$0xff]  ;;  %v55_v27 = vld [vmem:[%s2870_s0 + $0x160] sm:$0xff] }
  0x1f   :  { %v118_v26 = vld [vmem:[%s2870_s0 + $0x358] sm:$0xff]  ;;  %v119_v28 = vld [vmem:[%s2870_s0 + $0x360] sm:$0xff] }
  0x20   :  { %1645 = vmatmul.mubr.msk.f32.gmra.mrb[12].mxu0 %vm141_vm0, %v24_v29  ;;  %v56_v29 = vld [vmem:[%s2870_s0 + $0x168] sm:$0xff] }
  0x21   :  { %1741 = vmatmul.mubr.msk.f32.gmra.mrb[12].mxu1 %vm141_vm0, %v88_v30  ;;  %1647 = vmatprep.mubr.msk.f32.mxu0 %vm141_vm0, %v25_v31  ;;  %v120_v30 = vld [vmem:[%s2870_s0 + $0x368] sm:$0xff]  ;;  %v57_v31 = vld [vmem:[%s2870_s0 + $0x170] sm:$0xff] }
  0x22   :  { %1743 = vmatprep.mubr.msk.f32.mxu1 %vm141_vm0, %v89_v32  ;;  %v121_v32 = vld [vmem:[%s2870_s0 + $0x370] sm:$0xff] }
  0x24   :  { %1648 = vmatmul.mubr.msk.f32.gmra.mrb[14].mxu0 %vm141_vm0, %v26_v33  ;;  %v58_v33 = vld [vmem:[%s2870_s0 + $0x178] sm:$0xff] }
  0x25   :  { %1744 = vmatmul.mubr.msk.f32.gmra.mrb[14].mxu1 %vm141_vm0, %v90_v34  ;;  %1650 = vmatprep.mubr.msk.f32.mxu0 %vm141_vm0, %v27_v35  ;;  %v122_v34 = vld [vmem:[%s2870_s0 + $0x378] sm:$0xff]  ;;  %v59_v35 = vld [vmem:[%s2870_s0 + $0x180] sm:$0xff] }
  0x26   :  { %1746 = vmatprep.mubr.msk.f32.mxu1 %vm141_vm0, %v91_v36  ;;  %v123_v36 = vld [vmem:[%s2870_s0 + $0x380] sm:$0xff] }
  0x28   :  { %1651 = vmatmul.mubr.msk.f32.gmra.mrb[16].mxu0 %vm141_vm0, %v28_v37  ;;  %v60_v37 = vld [vmem:[%s2870_s0 + $0x188] sm:$0xff] }
  0x29   :  { %1747 = vmatmul.mubr.msk.f32.gmra.mrb[16].mxu1 %vm141_vm0, %v92_v38  ;;  %1653 = vmatprep.mubr.msk.f32.mxu0 %vm141_vm0, %v29_v39  ;;  %v124_v38 = vld [vmem:[%s2870_s0 + $0x388] sm:$0xff]  ;;  %v61_v39 = vld [vmem:[%s2870_s0 + $0x190] sm:$0xff] }
  0x2a   :  { %1749 = vmatprep.mubr.msk.f32.mxu1 %vm141_vm0, %v93_v40  ;;  %v125_v40 = vld [vmem:[%s2870_s0 + $0x390] sm:$0xff] }
  0x2c   :  { %1654 = vmatmul.mubr.msk.f32.gmra.mrb[18].mxu0 %vm141_vm0, %v30_v41  ;;  %v62_v41 = vld [vmem:[%s2870_s0 + $0x198] sm:$0xff] }
  0x2d   :  { %1750 = vmatmul.mubr.msk.f32.gmra.mrb[18].mxu1 %vm141_vm0, %v94_v42  ;;  %1656 = vmatprep.mubr.msk.f32.mxu0 %vm141_vm0, %v31_v43  ;;  %v126_v42 = vld [vmem:[%s2870_s0 + $0x398] sm:$0xff]  ;;  %v63_v43 = vld [vmem:[%s2870_s0 + $0x1a0] sm:$0xff] }
  0x2e   :  { %1752 = vmatprep.mubr.msk.f32.mxu1 %vm141_vm0, %v95_v44  ;;  %v127_v44 = vld [vmem:[%s2870_s0 + $0x3a0] sm:$0xff] }
  0x30   :  { %1657 = vmatmul.mubr.msk.f32.gmra.mrb[20].mxu0 %vm141_vm0, %v32_v45  ;;  %v64_v45 = vld [vmem:[%s2870_s0 + $0x1a8] sm:$0xff] }
  0x31   :  { %1753 = vmatmul.mubr.msk.f32.gmra.mrb[20].mxu1 %vm141_vm0, %v96_v46  ;;  %1659 = vmatprep.mubr.msk.f32.mxu0 %vm141_vm0, %v33_v47  ;;  %v128_v46 = vld [vmem:[%s2870_s0 + $0x3a8] sm:$0xff]  ;;  %v65_v47 = vld [vmem:[%s2870_s0 + $0x1b0] sm:$0xff] }
  0x32   :  { %1755 = vmatprep.mubr.msk.f32.mxu1 %vm141_vm0, %v97_v48  ;;  %v129_v48 = vld [vmem:[%s2870_s0 + $0x3b0] sm:$0xff] }
  0x34   :  { %1660 = vmatmul.mubr.msk.f32.gmra.mrb[22].mxu0 %vm141_vm0, %v34_v49  ;;  %v66_v49 = vld [vmem:[%s2870_s0 + $0x1b8] sm:$0xff] }
  0x35   :  { %1756 = vmatmul.mubr.msk.f32.gmra.mrb[22].mxu1 %vm141_vm0, %v98_v50  ;;  %1662 = vmatprep.mubr.msk.f32.mxu0 %vm141_vm0, %v35_v51  ;;  %v130_v50 = vld [vmem:[%s2870_s0 + $0x3b8] sm:$0xff]  ;;  %v67_v51 = vld [vmem:[%s2870_s0 + $0x1c0] sm:$0xff] }
  0x36   :  { %1758 = vmatprep.mubr.msk.f32.mxu1 %vm141_vm0, %v99_v52  ;;  %v131_v52 = vld [vmem:[%s2870_s0 + $0x3c0] sm:$0xff] }
  0x38   :  { %1663 = vmatmul.mubr.msk.f32.gmra.mrb[24].mxu0 %vm141_vm0, %v36_v53  ;;  %v68_v53 = vld [vmem:[%s2870_s0 + $0x1c8] sm:$0xff] }
  0x39   :  { %1759 = vmatmul.mubr.msk.f32.gmra.mrb[24].mxu1 %vm141_vm0, %v100_v54  ;;  %1665 = vmatprep.mubr.msk.f32.mxu0 %vm141_vm0, %v37_v55  ;;  %v132_v54 = vld [vmem:[%s2870_s0 + $0x3c8] sm:$0xff]  ;;  %v69_v55 = vld [vmem:[%s2870_s0 + $0x1d0] sm:$0xff] }
  0x3a   :  { %1761 = vmatprep.mubr.msk.f32.mxu1 %vm141_vm0, %v101_v56  ;;  %v133_v56 = vld [vmem:[%s2870_s0 + $0x3d0] sm:$0xff] }
  0x3c   :  { %1666 = vmatmul.mubr.msk.f32.gmra.mrb[26].mxu0 %vm141_vm0, %v38_v57  ;;  %v70_v57 = vld [vmem:[%s2870_s0 + $0x1d8] sm:$0xff] }
  0x3d   :  { %1762 = vmatmul.mubr.msk.f32.gmra.mrb[26].mxu1 %vm141_vm0, %v102_v58  ;;  %1668 = vmatprep.mubr.msk.f32.mxu0 %vm141_vm0, %v39_v59  ;;  %v134_v58 = vld [vmem:[%s2870_s0 + $0x3d8] sm:$0xff]  ;;  %v71_v59 = vld [vmem:[%s2870_s0 + $0x1e0] sm:$0xff] }
  0x3e   :  { %1764 = vmatprep.mubr.msk.f32.mxu1 %vm141_vm0, %v103_v60  ;;  %v135_v60 = vld [vmem:[%s2870_s0 + $0x3e0] sm:$0xff] }
  0x40   :  { %1669 = vmatmul.mubr.msk.f32.gmra.mrb[28].mxu0 %vm141_vm0, %v40_v61  ;;  %v72_v61 = vld [vmem:[%s2870_s0 + $0x1e8] sm:$0xff] }
  0x41   :  { %1765 = vmatmul.mubr.msk.f32.gmra.mrb[28].mxu1 %vm141_vm0, %v104_v62  ;;  %1671 = vmatprep.mubr.msk.f32.mxu0 %vm141_vm0, %v41_v63  ;;  %v136_v62 = vld [vmem:[%s2870_s0 + $0x3e8] sm:$0xff]  ;;  %v73_v63 = vld [vmem:[%s2870_s0 + $0x1f0] sm:$0xff] }
  0x42   :  { %1767 = vmatprep.mubr.msk.f32.mxu1 %vm141_vm0, %v105_v0  ;;  %v137_v0 = vld [vmem:[%s2870_s0 + $0x3f0] sm:$0xff] }
  0x44   :  { %1672 = vmatmul.mubr.msk.f32.gmra.mrb[30].mxu0 %vm141_vm0, %v42_v1  ;;  %v74_v1 = vld [vmem:[%s2870_s0 + $0x1f8] sm:$0xff] }
  0x45   :  { %1768 = vmatmul.mubr.msk.f32.gmra.mrb[30].mxu1 %vm141_vm0, %v106_v2  ;;  %1674 = vmatprep.mubr.msk.f32.mxu0 %vm141_vm0, %v43_v3  ;;  %v138_v2 = vld [vmem:[%s2870_s0 + $0x3f8] sm:$0xff] }
  0x46   :  { %1770 = vmatprep.mubr.msk.f32.mxu1 %vm141_vm0, %v107_v4 }
  0x48   :  { %1675 = vmatmul.mubr.msk.f32.gmra.mrb[32].mxu0 %vm141_vm0, %v44_v5 }
  0x49   :  { %1771 = vmatmul.mubr.msk.f32.gmra.mrb[32].mxu1 %vm141_vm0, %v108_v6  ;;  %1677 = vmatprep.mubr.msk.f32.mxu0 %vm141_vm0, %v45_v7 }
  0x4a   :  { %1773 = vmatprep.mubr.msk.f32.mxu1 %vm141_vm0, %v109_v8 }
  0x4c   :  { %1678 = vmatmul.mubr.msk.f32.gmra.mrb[34].mxu0 %vm141_vm0, %v46_v9 }
  0x4d   :  { %1774 = vmatmul.mubr.msk.f32.gmra.mrb[34].mxu1 %vm141_vm0, %v110_v10  ;;  %1680 = vmatprep.mubr.msk.f32.mxu0 %vm141_vm0, %v47_v11 }
  0x4e   :  { %1776 = vmatprep.mubr.msk.f32.mxu1 %vm141_vm0, %v111_v12 }
  0x50   :  { %1681 = vmatmul.mubr.msk.f32.gmra.mrb[36].mxu0 %vm141_vm0, %v48_v13 }
  0x51   :  { %1777 = vmatmul.mubr.msk.f32.gmra.mrb[36].mxu1 %vm141_vm0, %v112_v14  ;;  %1683 = vmatprep.mubr.msk.f32.mxu0 %vm141_vm0, %v49_v15 }
  0x52   :  { %1779 = vmatprep.mubr.msk.f32.mxu1 %vm141_vm0, %v113_v16 }
  0x54   :  { %1684 = vmatmul.mubr.msk.f32.gmra.mrb[38].mxu0 %vm141_vm0, %v50_v17 }
  0x55   :  { %1780 = vmatmul.mubr.msk.f32.gmra.mrb[38].mxu1 %vm141_vm0, %v114_v18  ;;  %1686 = vmatprep.mubr.msk.f32.mxu0 %vm141_vm0, %v51_v19 }
  0x56   :  { %1782 = vmatprep.mubr.msk.f32.mxu1 %vm141_vm0, %v115_v20 }
  0x58   :  { %1687 = vmatmul.mubr.msk.f32.gmra.mrb[40].mxu0 %vm141_vm0, %v52_v21 }
  0x59   :  { %1783 = vmatmul.mubr.msk.f32.gmra.mrb[40].mxu1 %vm141_vm0, %v116_v22  ;;  %1689 = vmatprep.mubr.msk.f32.mxu0 %vm141_vm0, %v53_v23 }
  0x5a   :  { %1785 = vmatprep.mubr.msk.f32.mxu1 %vm141_vm0, %v117_v24 }
  0x5c   :  { %1690 = vmatmul.mubr.msk.f32.gmra.mrb[42].mxu0 %vm141_vm0, %v54_v25 }
  0x5d   :  { %1786 = vmatmul.mubr.msk.f32.gmra.mrb[42].mxu1 %vm141_vm0, %v118_v26  ;;  %1692 = vmatprep.mubr.msk.f32.mxu0 %vm141_vm0, %v55_v27 }
  0x5e   :  { %1788 = vmatprep.mubr.msk.f32.mxu1 %vm141_vm0, %v119_v28 }
  0x60   :  { %1693 = vmatmul.mubr.msk.f32.gmra.mrb[44].mxu0 %vm141_vm0, %v56_v29 }
  0x61   :  { %1789 = vmatmul.mubr.msk.f32.gmra.mrb[44].mxu1 %vm141_vm0, %v120_v30  ;;  %1695 = vmatprep.mubr.msk.f32.mxu0 %vm141_vm0, %v57_v31 }
  0x62   :  { %1791 = vmatprep.mubr.msk.f32.mxu1 %vm141_vm0, %v121_v32 }
  0x64   :  { %1696 = vmatmul.mubr.msk.f32.gmra.mrb[46].mxu0 %vm141_vm0, %v58_v33 }
  0x65   :  { %1792 = vmatmul.mubr.msk.f32.gmra.mrb[46].mxu1 %vm141_vm0, %v122_v34  ;;  %1698 = vmatprep.mubr.msk.f32.mxu0 %vm141_vm0, %v59_v35 }
  0x66   :  { %1794 = vmatprep.mubr.msk.f32.mxu1 %vm141_vm0, %v123_v36 }
  0x68   :  { %1699 = vmatmul.mubr.msk.f32.gmra.mrb[48].mxu0 %vm141_vm0, %v60_v37 }
  0x69   :  { %1795 = vmatmul.mubr.msk.f32.gmra.mrb[48].mxu1 %vm141_vm0, %v124_v38  ;;  %1701 = vmatprep.mubr.msk.f32.mxu0 %vm141_vm0, %v61_v39 }
  0x6a   :  { %1797 = vmatprep.mubr.msk.f32.mxu1 %vm141_vm0, %v125_v40 }
  0x6c   :  { %1702 = vmatmul.mubr.msk.f32.gmra.mrb[50].mxu0 %vm141_vm0, %v62_v41 }
  0x6d   :  { %1798 = vmatmul.mubr.msk.f32.gmra.mrb[50].mxu1 %vm141_vm0, %v126_v42  ;;  %1704 = vmatprep.mubr.msk.f32.mxu0 %vm141_vm0, %v63_v43 }
  0x6e   :  { %1800 = vmatprep.mubr.msk.f32.mxu1 %vm141_vm0, %v127_v44 }
  0x70   :  { %1705 = vmatmul.mubr.msk.f32.gmra.mrb[52].mxu0 %vm141_vm0, %v64_v45 }
  0x71   :  { %1801 = vmatmul.mubr.msk.f32.gmra.mrb[52].mxu1 %vm141_vm0, %v128_v46  ;;  %1707 = vmatprep.mubr.msk.f32.mxu0 %vm141_vm0, %v65_v47 }
  0x72   :  { %1803 = vmatprep.mubr.msk.f32.mxu1 %vm141_vm0, %v129_v48 }
  0x74   :  { %1708 = vmatmul.mubr.msk.f32.gmra.mrb[54].mxu0 %vm141_vm0, %v66_v49 }
  0x75   :  { %1804 = vmatmul.mubr.msk.f32.gmra.mrb[54].mxu1 %vm141_vm0, %v130_v50  ;;  %1710 = vmatprep.mubr.msk.f32.mxu0 %vm141_vm0, %v67_v51 }
  0x76   :  { %1806 = vmatprep.mubr.msk.f32.mxu1 %vm141_vm0, %v131_v52 }
  0x78   :  { %1711 = vmatmul.mubr.msk.f32.gmra.mrb[56].mxu0 %vm141_vm0, %v68_v53 }
  0x79   :  { %1807 = vmatmul.mubr.msk.f32.gmra.mrb[56].mxu1 %vm141_vm0, %v132_v54  ;;  %1713 = vmatprep.mubr.msk.f32.mxu0 %vm141_vm0, %v69_v55 }
  0x7a   :  { %1809 = vmatprep.mubr.msk.f32.mxu1 %vm141_vm0, %v133_v56 }
  0x7c   :  { %1714 = vmatmul.mubr.msk.f32.gmra.mrb[58].mxu0 %vm141_vm0, %v70_v57 }
  0x7d   :  { %1810 = vmatmul.mubr.msk.f32.gmra.mrb[58].mxu1 %vm141_vm0, %v134_v58  ;;  %1716 = vmatprep.mubr.msk.f32.mxu0 %vm141_vm0, %v71_v59 }
  0x7e   :  { %1812 = vmatprep.mubr.msk.f32.mxu1 %vm141_vm0, %v135_v60 }
  0x80   :  { %1717 = vmatmul.mubr.msk.f32.gmra.mrb[60].mxu0 %vm141_vm0, %v72_v61 }
  0x81   :  { %1813 = vmatmul.mubr.msk.f32.gmra.mrb[60].mxu1 %vm141_vm0, %v136_v62  ;;  %1719 = vmatprep.mubr.msk.f32.mxu0 %vm141_vm0, %v73_v63 }
  0x82   :  { %1815 = vmatprep.mubr.msk.f32.mxu1 %vm141_vm0, %v137_v0 }
  0x84   :  { %1720 = vmatmul.mubr.msk.f32.gmra.mrb[62].mxu0 %vm141_vm0, %v74_v1 }
  0x85   :  { %1816 = vmatmul.mubr.msk.f32.gmra.mrb[62].mxu1 %vm141_vm0, %v138_v2 }
  0xdb   :  { %v1628_v3 = vpop.f32.mrb[0].mxu0 }
  0xdc   :  { %v1724_v4 = vpop.f32.mrb[0].mxu1  ;;  %1233 = vst.msk [vmem:[%s2871_s2 + $0x8] sm:$0xff] %vm1231_vm1, %v1628_v3  ;;  %v592_v5 = vpop.f32.mrb[1].mxu0 }
  0xdd   :  { %1297 = vst.msk [vmem:[%s2871_s2 + $0x208] sm:$0xff] %vm1231_vm1, %v1724_v4  ;;  %v912_v6 = vpop.f32.mrb[1].mxu1  ;;  %1232 = vst.msk [vmem:[%s2871_s2] sm:$0xff] %vm1231_vm1, %v592_v5 }
  0xde   :  { %1296 = vst.msk [vmem:[%s2871_s2 + $0x200] sm:$0xff] %vm1231_vm1, %v912_v6 }
  0xdf   :  { %v1631_v7 = vpop.f32.mrb[2].mxu0 }
  0xe0   :  { %v1727_v8 = vpop.f32.mrb[2].mxu1  ;;  %1235 = vst.msk [vmem:[%s2871_s2 + $0x18] sm:$0xff] %vm1231_vm1, %v1631_v7  ;;  %v602_v9 = vpop.f32.mrb[3].mxu0 }
  0xe1   :  { %1299 = vst.msk [vmem:[%s2871_s2 + $0x218] sm:$0xff] %vm1231_vm1, %v1727_v8  ;;  %v922_v10 = vpop.f32.mrb[3].mxu1  ;;  %1234 = vst.msk [vmem:[%s2871_s2 + $0x10] sm:$0xff] %vm1231_vm1, %v602_v9 }
  0xe2   :  { %1298 = vst.msk [vmem:[%s2871_s2 + $0x210] sm:$0xff] %vm1231_vm1, %v922_v10 }
  0xe3   :  { %v1634_v11 = vpop.f32.mrb[4].mxu0 }
  0xe4   :  { %v1730_v12 = vpop.f32.mrb[4].mxu1  ;;  %1237 = vst.msk [vmem:[%s2871_s2 + $0x28] sm:$0xff] %vm1231_vm1, %v1634_v11  ;;  %v612_v13 = vpop.f32.mrb[5].mxu0 }
  0xe5   :  { %1301 = vst.msk [vmem:[%s2871_s2 + $0x228] sm:$0xff] %vm1231_vm1, %v1730_v12  ;;  %v932_v14 = vpop.f32.mrb[5].mxu1  ;;  %1236 = vst.msk [vmem:[%s2871_s2 + $0x20] sm:$0xff] %vm1231_vm1, %v612_v13 }
  0xe6   :  { %1300 = vst.msk [vmem:[%s2871_s2 + $0x220] sm:$0xff] %vm1231_vm1, %v932_v14 }
  0xe7   :  { %v1637_v15 = vpop.f32.mrb[6].mxu0 }
  0xe8   :  { %v1733_v16 = vpop.f32.mrb[6].mxu1  ;;  %1239 = vst.msk [vmem:[%s2871_s2 + $0x38] sm:$0xff] %vm1231_vm1, %v1637_v15  ;;  %v622_v17 = vpop.f32.mrb[7].mxu0 }
  0xe9   :  { %1303 = vst.msk [vmem:[%s2871_s2 + $0x238] sm:$0xff] %vm1231_vm1, %v1733_v16  ;;  %v942_v18 = vpop.f32.mrb[7].mxu1  ;;  %1238 = vst.msk [vmem:[%s2871_s2 + $0x30] sm:$0xff] %vm1231_vm1, %v622_v17 }
  0xea   :  { %1302 = vst.msk [vmem:[%s2871_s2 + $0x230] sm:$0xff] %vm1231_vm1, %v942_v18 }
  0xeb   :  { %v1640_v19 = vpop.f32.mrb[8].mxu0 }
  0xec   :  { %v1736_v20 = vpop.f32.mrb[8].mxu1  ;;  %1241 = vst.msk [vmem:[%s2871_s2 + $0x48] sm:$0xff] %vm1231_vm1, %v1640_v19  ;;  %v632_v21 = vpop.f32.mrb[9].mxu0 }
  0xed   :  { %1305 = vst.msk [vmem:[%s2871_s2 + $0x248] sm:$0xff] %vm1231_vm1, %v1736_v20  ;;  %v952_v22 = vpop.f32.mrb[9].mxu1  ;;  %1240 = vst.msk [vmem:[%s2871_s2 + $0x40] sm:$0xff] %vm1231_vm1, %v632_v21 }
  0xee   :  { %1304 = vst.msk [vmem:[%s2871_s2 + $0x240] sm:$0xff] %vm1231_vm1, %v952_v22 }
  0xef   :  { %v1643_v23 = vpop.f32.mrb[10].mxu0 }
  0xf0   :  { %v1739_v24 = vpop.f32.mrb[10].mxu1  ;;  %1243 = vst.msk [vmem:[%s2871_s2 + $0x58] sm:$0xff] %vm1231_vm1, %v1643_v23  ;;  %v642_v25 = vpop.f32.mrb[11].mxu0 }
  0xf1   :  { %1307 = vst.msk [vmem:[%s2871_s2 + $0x258] sm:$0xff] %vm1231_vm1, %v1739_v24  ;;  %v962_v26 = vpop.f32.mrb[11].mxu1  ;;  %1242 = vst.msk [vmem:[%s2871_s2 + $0x50] sm:$0xff] %vm1231_vm1, %v642_v25 }
  0xf2   :  { %1306 = vst.msk [vmem:[%s2871_s2 + $0x250] sm:$0xff] %vm1231_vm1, %v962_v26 }
  0xf3   :  { %v1646_v27 = vpop.f32.mrb[12].mxu0 }
  0xf4   :  { %v1742_v28 = vpop.f32.mrb[12].mxu1  ;;  %1245 = vst.msk [vmem:[%s2871_s2 + $0x68] sm:$0xff] %vm1231_vm1, %v1646_v27  ;;  %v652_v29 = vpop.f32.mrb[13].mxu0 }
  0xf5   :  { %1309 = vst.msk [vmem:[%s2871_s2 + $0x268] sm:$0xff] %vm1231_vm1, %v1742_v28  ;;  %v972_v30 = vpop.f32.mrb[13].mxu1  ;;  %1244 = vst.msk [vmem:[%s2871_s2 + $0x60] sm:$0xff] %vm1231_vm1, %v652_v29 }
  0xf6   :  { %1308 = vst.msk [vmem:[%s2871_s2 + $0x260] sm:$0xff] %vm1231_vm1, %v972_v30 }
  0xf7   :  { %v1649_v31 = vpop.f32.mrb[14].mxu0 }
  0xf8   :  { %v1745_v32 = vpop.f32.mrb[14].mxu1  ;;  %1247 = vst.msk [vmem:[%s2871_s2 + $0x78] sm:$0xff] %vm1231_vm1, %v1649_v31  ;;  %v662_v33 = vpop.f32.mrb[15].mxu0 }
  0xf9   :  { %1311 = vst.msk [vmem:[%s2871_s2 + $0x278] sm:$0xff] %vm1231_vm1, %v1745_v32  ;;  %v982_v34 = vpop.f32.mrb[15].mxu1  ;;  %1246 = vst.msk [vmem:[%s2871_s2 + $0x70] sm:$0xff] %vm1231_vm1, %v662_v33 }
  0xfa   :  { %1310 = vst.msk [vmem:[%s2871_s2 + $0x270] sm:$0xff] %vm1231_vm1, %v982_v34 }
  0xfb   :  { %v1652_v35 = vpop.f32.mrb[16].mxu0 }
  0xfc   :  { %v1748_v36 = vpop.f32.mrb[16].mxu1  ;;  %1249 = vst.msk [vmem:[%s2871_s2 + $0x88] sm:$0xff] %vm1231_vm1, %v1652_v35  ;;  %v672_v37 = vpop.f32.mrb[17].mxu0 }
  0xfd   :  { %1313 = vst.msk [vmem:[%s2871_s2 + $0x288] sm:$0xff] %vm1231_vm1, %v1748_v36  ;;  %v992_v38 = vpop.f32.mrb[17].mxu1  ;;  %1248 = vst.msk [vmem:[%s2871_s2 + $0x80] sm:$0xff] %vm1231_vm1, %v672_v37 }
  0xfe   :  { %1312 = vst.msk [vmem:[%s2871_s2 + $0x280] sm:$0xff] %vm1231_vm1, %v992_v38 }
  0xff   :  { %v1655_v39 = vpop.f32.mrb[18].mxu0 }
 0x100   :  { %v1751_v40 = vpop.f32.mrb[18].mxu1  ;;  %1251 = vst.msk [vmem:[%s2871_s2 + $0x98] sm:$0xff] %vm1231_vm1, %v1655_v39  ;;  %v682_v41 = vpop.f32.mrb[19].mxu0 }
 0x101   :  { %1315 = vst.msk [vmem:[%s2871_s2 + $0x298] sm:$0xff] %vm1231_vm1, %v1751_v40  ;;  %v1002_v42 = vpop.f32.mrb[19].mxu1  ;;  %1250 = vst.msk [vmem:[%s2871_s2 + $0x90] sm:$0xff] %vm1231_vm1, %v682_v41 }
 0x102   :  { %1314 = vst.msk [vmem:[%s2871_s2 + $0x290] sm:$0xff] %vm1231_vm1, %v1002_v42 }
 0x103   :  { %v1658_v43 = vpop.f32.mrb[20].mxu0 }
 0x104   :  { %v1754_v44 = vpop.f32.mrb[20].mxu1  ;;  %1253 = vst.msk [vmem:[%s2871_s2 + $0xa8] sm:$0xff] %vm1231_vm1, %v1658_v43  ;;  %v692_v45 = vpop.f32.mrb[21].mxu0 }
 0x105   :  { %1317 = vst.msk [vmem:[%s2871_s2 + $0x2a8] sm:$0xff] %vm1231_vm1, %v1754_v44  ;;  %v1012_v46 = vpop.f32.mrb[21].mxu1  ;;  %1252 = vst.msk [vmem:[%s2871_s2 + $0xa0] sm:$0xff] %vm1231_vm1, %v692_v45 }
 0x106   :  { %1316 = vst.msk [vmem:[%s2871_s2 + $0x2a0] sm:$0xff] %vm1231_vm1, %v1012_v46 }
 0x107   :  { %v1661_v47 = vpop.f32.mrb[22].mxu0 }
 0x108   :  { %v1757_v48 = vpop.f32.mrb[22].mxu1  ;;  %1255 = vst.msk [vmem:[%s2871_s2 + $0xb8] sm:$0xff] %vm1231_vm1, %v1661_v47  ;;  %v702_v49 = vpop.f32.mrb[23].mxu0 }
 0x109   :  { %1319 = vst.msk [vmem:[%s2871_s2 + $0x2b8] sm:$0xff] %vm1231_vm1, %v1757_v48  ;;  %v1022_v50 = vpop.f32.mrb[23].mxu1  ;;  %1254 = vst.msk [vmem:[%s2871_s2 + $0xb0] sm:$0xff] %vm1231_vm1, %v702_v49 }
 0x10a   :  { %1318 = vst.msk [vmem:[%s2871_s2 + $0x2b0] sm:$0xff] %vm1231_vm1, %v1022_v50 }
 0x10b   :  { %v1664_v51 = vpop.f32.mrb[24].mxu0 }
 0x10c   :  { %v1760_v52 = vpop.f32.mrb[24].mxu1  ;;  %1257 = vst.msk [vmem:[%s2871_s2 + $0xc8] sm:$0xff] %vm1231_vm1, %v1664_v51  ;;  %v712_v53 = vpop.f32.mrb[25].mxu0 }
 0x10d   :  { %1321 = vst.msk [vmem:[%s2871_s2 + $0x2c8] sm:$0xff] %vm1231_vm1, %v1760_v52  ;;  %v1032_v54 = vpop.f32.mrb[25].mxu1  ;;  %1256 = vst.msk [vmem:[%s2871_s2 + $0xc0] sm:$0xff] %vm1231_vm1, %v712_v53 }
 0x10e   :  { %1320 = vst.msk [vmem:[%s2871_s2 + $0x2c0] sm:$0xff] %vm1231_vm1, %v1032_v54 }
 0x10f   :  { %v1667_v55 = vpop.f32.mrb[26].mxu0 }
 0x110   :  { %v1763_v56 = vpop.f32.mrb[26].mxu1  ;;  %1259 = vst.msk [vmem:[%s2871_s2 + $0xd8] sm:$0xff] %vm1231_vm1, %v1667_v55  ;;  %v722_v57 = vpop.f32.mrb[27].mxu0 }
 0x111   :  { %1323 = vst.msk [vmem:[%s2871_s2 + $0x2d8] sm:$0xff] %vm1231_vm1, %v1763_v56  ;;  %v1042_v58 = vpop.f32.mrb[27].mxu1  ;;  %1258 = vst.msk [vmem:[%s2871_s2 + $0xd0] sm:$0xff] %vm1231_vm1, %v722_v57 }
 0x112   :  { %1322 = vst.msk [vmem:[%s2871_s2 + $0x2d0] sm:$0xff] %vm1231_vm1, %v1042_v58 }
 0x113   :  { %v1670_v59 = vpop.f32.mrb[28].mxu0 }
 0x114   :  { %v1766_v60 = vpop.f32.mrb[28].mxu1  ;;  %1261 = vst.msk [vmem:[%s2871_s2 + $0xe8] sm:$0xff] %vm1231_vm1, %v1670_v59  ;;  %v732_v61 = vpop.f32.mrb[29].mxu0 }
 0x115   :  { %1325 = vst.msk [vmem:[%s2871_s2 + $0x2e8] sm:$0xff] %vm1231_vm1, %v1766_v60  ;;  %v1052_v62 = vpop.f32.mrb[29].mxu1  ;;  %1260 = vst.msk [vmem:[%s2871_s2 + $0xe0] sm:$0xff] %vm1231_vm1, %v732_v61 }
 0x116   :  { %1324 = vst.msk [vmem:[%s2871_s2 + $0x2e0] sm:$0xff] %vm1231_vm1, %v1052_v62 }
 0x117   :  { %v1673_v63 = vpop.f32.mrb[30].mxu0 }
 0x118   :  { %v1769_v0 = vpop.f32.mrb[30].mxu1  ;;  %1263 = vst.msk [vmem:[%s2871_s2 + $0xf8] sm:$0xff] %vm1231_vm1, %v1673_v63  ;;  %v742_v1 = vpop.f32.mrb[31].mxu0 }
 0x119   :  { %1327 = vst.msk [vmem:[%s2871_s2 + $0x2f8] sm:$0xff] %vm1231_vm1, %v1769_v0  ;;  %v1062_v2 = vpop.f32.mrb[31].mxu1  ;;  %1262 = vst.msk [vmem:[%s2871_s2 + $0xf0] sm:$0xff] %vm1231_vm1, %v742_v1 }
 0x11a   :  { %1326 = vst.msk [vmem:[%s2871_s2 + $0x2f0] sm:$0xff] %vm1231_vm1, %v1062_v2 }
 0x11b   :  { %v1676_v3 = vpop.f32.mrb[32].mxu0 }
 0x11c   :  { %v1772_v4 = vpop.f32.mrb[32].mxu1  ;;  %1265 = vst.msk [vmem:[%s2871_s2 + $0x108] sm:$0xff] %vm1231_vm1, %v1676_v3  ;;  %v752_v5 = vpop.f32.mrb[33].mxu0 }
 0x11d   :  { %1329 = vst.msk [vmem:[%s2871_s2 + $0x308] sm:$0xff] %vm1231_vm1, %v1772_v4  ;;  %v1072_v6 = vpop.f32.mrb[33].mxu1  ;;  %1264 = vst.msk [vmem:[%s2871_s2 + $0x100] sm:$0xff] %vm1231_vm1, %v752_v5 }
 0x11e   :  { %1328 = vst.msk [vmem:[%s2871_s2 + $0x300] sm:$0xff] %vm1231_vm1, %v1072_v6 }
 0x11f   :  { %v1679_v7 = vpop.f32.mrb[34].mxu0 }
 0x120   :  { %v1775_v8 = vpop.f32.mrb[34].mxu1  ;;  %1267 = vst.msk [vmem:[%s2871_s2 + $0x118] sm:$0xff] %vm1231_vm1, %v1679_v7  ;;  %v762_v9 = vpop.f32.mrb[35].mxu0 }
 0x121   :  { %1331 = vst.msk [vmem:[%s2871_s2 + $0x318] sm:$0xff] %vm1231_vm1, %v1775_v8  ;;  %v1082_v10 = vpop.f32.mrb[35].mxu1  ;;  %1266 = vst.msk [vmem:[%s2871_s2 + $0x110] sm:$0xff] %vm1231_vm1, %v762_v9 }
 0x122   :  { %1330 = vst.msk [vmem:[%s2871_s2 + $0x310] sm:$0xff] %vm1231_vm1, %v1082_v10 }
 0x123   :  { %v1682_v11 = vpop.f32.mrb[36].mxu0 }
 0x124   :  { %v1778_v12 = vpop.f32.mrb[36].mxu1  ;;  %1269 = vst.msk [vmem:[%s2871_s2 + $0x128] sm:$0xff] %vm1231_vm1, %v1682_v11  ;;  %v772_v13 = vpop.f32.mrb[37].mxu0 }
 0x125   :  { %1333 = vst.msk [vmem:[%s2871_s2 + $0x328] sm:$0xff] %vm1231_vm1, %v1778_v12  ;;  %v1092_v14 = vpop.f32.mrb[37].mxu1  ;;  %1268 = vst.msk [vmem:[%s2871_s2 + $0x120] sm:$0xff] %vm1231_vm1, %v772_v13 }
 0x126   :  { %1332 = vst.msk [vmem:[%s2871_s2 + $0x320] sm:$0xff] %vm1231_vm1, %v1092_v14 }
 0x127   :  { %v1685_v15 = vpop.f32.mrb[38].mxu0 }
 0x128   :  { %v1781_v16 = vpop.f32.mrb[38].mxu1  ;;  %1271 = vst.msk [vmem:[%s2871_s2 + $0x138] sm:$0xff] %vm1231_vm1, %v1685_v15  ;;  %v782_v17 = vpop.f32.mrb[39].mxu0 }
 0x129   :  { %1335 = vst.msk [vmem:[%s2871_s2 + $0x338] sm:$0xff] %vm1231_vm1, %v1781_v16  ;;  %v1102_v18 = vpop.f32.mrb[39].mxu1  ;;  %1270 = vst.msk [vmem:[%s2871_s2 + $0x130] sm:$0xff] %vm1231_vm1, %v782_v17 }
 0x12a   :  { %1334 = vst.msk [vmem:[%s2871_s2 + $0x330] sm:$0xff] %vm1231_vm1, %v1102_v18 }
 0x12b   :  { %v1688_v19 = vpop.f32.mrb[40].mxu0 }
 0x12c   :  { %v1784_v20 = vpop.f32.mrb[40].mxu1  ;;  %1273 = vst.msk [vmem:[%s2871_s2 + $0x148] sm:$0xff] %vm1231_vm1, %v1688_v19  ;;  %v792_v21 = vpop.f32.mrb[41].mxu0 }
 0x12d   :  { %1337 = vst.msk [vmem:[%s2871_s2 + $0x348] sm:$0xff] %vm1231_vm1, %v1784_v20  ;;  %v1112_v22 = vpop.f32.mrb[41].mxu1  ;;  %1272 = vst.msk [vmem:[%s2871_s2 + $0x140] sm:$0xff] %vm1231_vm1, %v792_v21 }
 0x12e   :  { %1336 = vst.msk [vmem:[%s2871_s2 + $0x340] sm:$0xff] %vm1231_vm1, %v1112_v22 }
 0x12f   :  { %v1691_v23 = vpop.f32.mrb[42].mxu0 }
 0x130   :  { %v1787_v24 = vpop.f32.mrb[42].mxu1  ;;  %1275 = vst.msk [vmem:[%s2871_s2 + $0x158] sm:$0xff] %vm1231_vm1, %v1691_v23  ;;  %v802_v25 = vpop.f32.mrb[43].mxu0 }
 0x131   :  { %1339 = vst.msk [vmem:[%s2871_s2 + $0x358] sm:$0xff] %vm1231_vm1, %v1787_v24  ;;  %v1122_v26 = vpop.f32.mrb[43].mxu1  ;;  %1274 = vst.msk [vmem:[%s2871_s2 + $0x150] sm:$0xff] %vm1231_vm1, %v802_v25 }
 0x132   :  { %1338 = vst.msk [vmem:[%s2871_s2 + $0x350] sm:$0xff] %vm1231_vm1, %v1122_v26 }
 0x133   :  { %v1694_v27 = vpop.f32.mrb[44].mxu0 }
 0x134   :  { %v1790_v28 = vpop.f32.mrb[44].mxu1  ;;  %1277 = vst.msk [vmem:[%s2871_s2 + $0x168] sm:$0xff] %vm1231_vm1, %v1694_v27  ;;  %v812_v29 = vpop.f32.mrb[45].mxu0 }
 0x135   :  { %1341 = vst.msk [vmem:[%s2871_s2 + $0x368] sm:$0xff] %vm1231_vm1, %v1790_v28  ;;  %v1132_v30 = vpop.f32.mrb[45].mxu1  ;;  %1276 = vst.msk [vmem:[%s2871_s2 + $0x160] sm:$0xff] %vm1231_vm1, %v812_v29 }
 0x136   :  { %1340 = vst.msk [vmem:[%s2871_s2 + $0x360] sm:$0xff] %vm1231_vm1, %v1132_v30 }
 0x137   :  { %v1697_v31 = vpop.f32.mrb[46].mxu0 }
 0x138   :  { %v1793_v32 = vpop.f32.mrb[46].mxu1  ;;  %1279 = vst.msk [vmem:[%s2871_s2 + $0x178] sm:$0xff] %vm1231_vm1, %v1697_v31  ;;  %v822_v33 = vpop.f32.mrb[47].mxu0 }
 0x139   :  { %1343 = vst.msk [vmem:[%s2871_s2 + $0x378] sm:$0xff] %vm1231_vm1, %v1793_v32  ;;  %v1142_v34 = vpop.f32.mrb[47].mxu1  ;;  %1278 = vst.msk [vmem:[%s2871_s2 + $0x170] sm:$0xff] %vm1231_vm1, %v822_v33 }
 0x13a   :  { %1342 = vst.msk [vmem:[%s2871_s2 + $0x370] sm:$0xff] %vm1231_vm1, %v1142_v34 }
 0x13b   :  { %v1700_v35 = vpop.f32.mrb[48].mxu0 }
 0x13c   :  { %v1796_v36 = vpop.f32.mrb[48].mxu1  ;;  %1281 = vst.msk [vmem:[%s2871_s2 + $0x188] sm:$0xff] %vm1231_vm1, %v1700_v35  ;;  %v832_v37 = vpop.f32.mrb[49].mxu0 }
 0x13d   :  { %1345 = vst.msk [vmem:[%s2871_s2 + $0x388] sm:$0xff] %vm1231_vm1, %v1796_v36  ;;  %v1152_v38 = vpop.f32.mrb[49].mxu1  ;;  %1280 = vst.msk [vmem:[%s2871_s2 + $0x180] sm:$0xff] %vm1231_vm1, %v832_v37 }
 0x13e   :  { %1344 = vst.msk [vmem:[%s2871_s2 + $0x380] sm:$0xff] %vm1231_vm1, %v1152_v38 }
 0x13f   :  { %v1703_v39 = vpop.f32.mrb[50].mxu0 }
 0x140   :  { %v1799_v40 = vpop.f32.mrb[50].mxu1  ;;  %1283 = vst.msk [vmem:[%s2871_s2 + $0x198] sm:$0xff] %vm1231_vm1, %v1703_v39  ;;  %v842_v41 = vpop.f32.mrb[51].mxu0 }
 0x141   :  { %1347 = vst.msk [vmem:[%s2871_s2 + $0x398] sm:$0xff] %vm1231_vm1, %v1799_v40  ;;  %v1162_v42 = vpop.f32.mrb[51].mxu1  ;;  %1282 = vst.msk [vmem:[%s2871_s2 + $0x190] sm:$0xff] %vm1231_vm1, %v842_v41 }
 0x142   :  { %1346 = vst.msk [vmem:[%s2871_s2 + $0x390] sm:$0xff] %vm1231_vm1, %v1162_v42 }
 0x143   :  { %v1706_v43 = vpop.f32.mrb[52].mxu0 }
 0x144   :  { %v1802_v44 = vpop.f32.mrb[52].mxu1  ;;  %1285 = vst.msk [vmem:[%s2871_s2 + $0x1a8] sm:$0xff] %vm1231_vm1, %v1706_v43  ;;  %v852_v45 = vpop.f32.mrb[53].mxu0 }
 0x145   :  { %1349 = vst.msk [vmem:[%s2871_s2 + $0x3a8] sm:$0xff] %vm1231_vm1, %v1802_v44  ;;  %v1172_v46 = vpop.f32.mrb[53].mxu1  ;;  %1284 = vst.msk [vmem:[%s2871_s2 + $0x1a0] sm:$0xff] %vm1231_vm1, %v852_v45 }
 0x146   :  { %1348 = vst.msk [vmem:[%s2871_s2 + $0x3a0] sm:$0xff] %vm1231_vm1, %v1172_v46 }
 0x147   :  { %v1709_v47 = vpop.f32.mrb[54].mxu0 }
 0x148   :  { %v1805_v48 = vpop.f32.mrb[54].mxu1  ;;  %1287 = vst.msk [vmem:[%s2871_s2 + $0x1b8] sm:$0xff] %vm1231_vm1, %v1709_v47  ;;  %v862_v49 = vpop.f32.mrb[55].mxu0 }
 0x149   :  { %1351 = vst.msk [vmem:[%s2871_s2 + $0x3b8] sm:$0xff] %vm1231_vm1, %v1805_v48  ;;  %v1182_v50 = vpop.f32.mrb[55].mxu1  ;;  %1286 = vst.msk [vmem:[%s2871_s2 + $0x1b0] sm:$0xff] %vm1231_vm1, %v862_v49 }
 0x14a   :  { %1350 = vst.msk [vmem:[%s2871_s2 + $0x3b0] sm:$0xff] %vm1231_vm1, %v1182_v50 }
 0x14b   :  { %v1712_v51 = vpop.f32.mrb[56].mxu0 }
 0x14c   :  { %v1808_v52 = vpop.f32.mrb[56].mxu1  ;;  %1289 = vst.msk [vmem:[%s2871_s2 + $0x1c8] sm:$0xff] %vm1231_vm1, %v1712_v51  ;;  %v872_v53 = vpop.f32.mrb[57].mxu0 }
 0x14d   :  { %1353 = vst.msk [vmem:[%s2871_s2 + $0x3c8] sm:$0xff] %vm1231_vm1, %v1808_v52  ;;  %v1192_v54 = vpop.f32.mrb[57].mxu1  ;;  %1288 = vst.msk [vmem:[%s2871_s2 + $0x1c0] sm:$0xff] %vm1231_vm1, %v872_v53 }
 0x14e   :  { %1352 = vst.msk [vmem:[%s2871_s2 + $0x3c0] sm:$0xff] %vm1231_vm1, %v1192_v54 }
 0x14f   :  { %v1715_v55 = vpop.f32.mrb[58].mxu0 }
 0x150   :  { %v1811_v56 = vpop.f32.mrb[58].mxu1  ;;  %1291 = vst.msk [vmem:[%s2871_s2 + $0x1d8] sm:$0xff] %vm1231_vm1, %v1715_v55  ;;  %v882_v57 = vpop.f32.mrb[59].mxu0 }
 0x151   :  { %1355 = vst.msk [vmem:[%s2871_s2 + $0x3d8] sm:$0xff] %vm1231_vm1, %v1811_v56  ;;  %v1202_v58 = vpop.f32.mrb[59].mxu1  ;;  %1290 = vst.msk [vmem:[%s2871_s2 + $0x1d0] sm:$0xff] %vm1231_vm1, %v882_v57 }
 0x152   :  { %1354 = vst.msk [vmem:[%s2871_s2 + $0x3d0] sm:$0xff] %vm1231_vm1, %v1202_v58 }
 0x153   :  { %v1718_v59 = vpop.f32.mrb[60].mxu0 }
 0x154   :  { %v1814_v60 = vpop.f32.mrb[60].mxu1  ;;  %1293 = vst.msk [vmem:[%s2871_s2 + $0x1e8] sm:$0xff] %vm1231_vm1, %v1718_v59  ;;  %v892_v61 = vpop.f32.mrb[61].mxu0 }
 0x155   :  { %1357 = vst.msk [vmem:[%s2871_s2 + $0x3e8] sm:$0xff] %vm1231_vm1, %v1814_v60  ;;  %v1212_v62 = vpop.f32.mrb[61].mxu1  ;;  %1292 = vst.msk [vmem:[%s2871_s2 + $0x1e0] sm:$0xff] %vm1231_vm1, %v892_v61 }
 0x156   :  { %1356 = vst.msk [vmem:[%s2871_s2 + $0x3e0] sm:$0xff] %vm1231_vm1, %v1212_v62 }
 0x157   :  { %v1721_v63 = vpop.f32.mrb[62].mxu0 }
 0x158   :  { %v1817_v0 = vpop.f32.mrb[62].mxu1  ;;  %1295 = vst.msk [vmem:[%s2871_s2 + $0x1f8] sm:$0xff] %vm1231_vm1, %v1721_v63  ;;  %v902_v1 = vpop.f32.mrb[63].mxu0 }
 0x159   :  { %1359 = vst.msk [vmem:[%s2871_s2 + $0x3f8] sm:$0xff] %vm1231_vm1, %v1817_v0  ;;  %v1222_v2 = vpop.f32.mrb[63].mxu1  ;;  %1294 = vst.msk [vmem:[%s2871_s2 + $0x1f0] sm:$0xff] %vm1231_vm1, %v902_v1 }
 0x15a   :  { %1358 = vst.msk [vmem:[%s2871_s2 + $0x3f0] sm:$0xff] %vm1231_vm1, %v1222_v2 }

</bundles_post_ra>
